<compile_context>
chip_gen: v5e
topology: v5e:2x2
jax: 0.10.0
libtpu: 0.0.40
codegen_flags: <defaults>
</compile_context>

<pallas_src>
import math

import jax
import jax.numpy as jnp
from jax import lax
from jax.experimental import pallas as pl
from jax.experimental.pallas import tpu as pltpu


def _num_tensorcores():
    """TensorCores sharing one Pallas grid (megacore): v7x / v4 / v5p -> 2."""
    try:
        kind = jax.devices()[0].device_kind.lower()
    except Exception:
        return 1
    if "v7" in kind or "v4" in kind or "v5p" in kind:
        return 2
    return 1


def _pick_row_pack(H, W):
    """Choose (R, Wp): pack R consecutive image rows along the lane axis, each
    occupying Wp >= W lanes, so the packed lane width R*Wp is a multiple of 128
    (dense, unmasked vector stores).  Prefers Wp == W (no lane padding)."""
    for r in range(1, H + 1):
        if H % r == 0 and (r * W) % 128 == 0:
            return r, W
    best = None
    for r in range(1, H + 1):
        if H % r:
            continue
        q = 128 // math.gcd(r, 128)            # Wp must be a multiple of q
        wp = -(-W // q) * q
        if best is None or wp < best[1] or (wp == best[1] and r > best[0]):
            best = (r, wp)
    return best


def _plan_blocks(total_rows, Hp, lane_width, itemsize, num_tc):
    """Rows of the packed 2-D view per grid step plus the (possibly padded)
    total row count.  Invariants: S is a multiple of Hp (blocks never split a
    plane), S is a multiple of the sublane tile (or equals the full extent),
    and padded_rows % S == 0."""
    sub = 8 * max(1, 4 // itemsize)                  # sublane tile: f32->8, bf16->16
    unit = Hp * sub // math.gcd(Hp, sub)             # legal block-row quantum
    cap_elems = (2 * 1024 * 1024) // 4               # ~2 MiB of f32 work per step
    cap_rows = max(unit, (cap_elems // lane_width) // unit * unit)

    min_steps = num_tc if (num_tc > 1 and total_rows >= num_tc * unit) else 1

    # 1) Exact tilings: S divides total_rows, S % unit == 0, S <= cap_rows.
    cands = [m for m in range(unit, min(cap_rows, total_rows) + 1, unit)
             if total_rows % m == 0]
    if num_tc > 1 and cands:
        balanced = [m for m in cands
                    if (total_rows // m) % num_tc == 0 and total_rows // m >= num_tc]
        cands = balanced or [m for m in cands if total_rows // m >= min_steps]
    if cands:
        pick = max(cands)
        # Accept unless the blocks are far below target while padding could fix it.
        if total_rows <= cap_rows or pick * 2 >= min(cap_rows, total_rows):
            return pick, total_rows

    # 2) Tiny tensors with no exact tiling: one full-extent block (always legal).
    if total_rows <= unit or (min_steps == 1 and total_rows <= cap_rows):
        return total_rows, total_rows

    # 3) Pad the plane count: near-target blocks, boundaries stay on planes.
    total_units = -(-total_rows // unit)
    steps = max(min_steps, -(-total_units // max(1, cap_rows // unit)))
    if num_tc > 1 and steps > 1 and steps % num_tc:
        steps += num_tc - steps % num_tc
    block_units = -(-total_units // steps)
    S = block_units * unit
    return S, S * steps


def _make_blur_kernel(Hp, W, Wp, R, S):
    """Blur on a (S, R*Wp) block of the packed layout.

    Each block holds S/Hp whole (b, c) planes; every packed row holds R
    consecutive image rows of one plane, each in a group of Wp lanes (the first
    W lanes are real pixels, the rest padding that is stripped afterwards)."""
    RW = R * Wp
    inv16 = 1.0 / 16.0

    def kernel(x_ref, o_ref):
        x = x_ref[...].astype(jnp.float32)                      # (S, RW) f32
        # Small iotas; jnp.where broadcasts them across the block (no full-size
        # int32 iota/mod temporaries).
        lane = lax.broadcasted_iota(jnp.int32, (1, RW), 1)
        jmod = lane % Wp                                         # in-row column
        imod = lax.broadcasted_iota(jnp.int32, (S, 1), 0) % Hp   # packed row in plane

        # ---- horizontal 1-2-1 with reflect at j==0 / j==W-1 ------------------
        xm = pltpu.roll(x, 1, 1)          # value at lane-1  (candidate j-1)
        xp = pltpu.roll(x, RW - 1, 1)     # value at lane+1  (candidate j+1)
        left = jnp.where(jmod == 0, xp, xm)
        right = jnp.where(jmod == W - 1, xm, xp)
        h = left + (x + x) + right

        # ---- vertical 1-2-1 with reflect at i==0 / i==H-1 --------------------
        # One image row = a lane shift of Wp, with a carry to the neighbouring
        # packed (sublane) row for the first / last lane group.
        if R > 1:
            a = pltpu.roll(h, Wp, 1)        # flat index - Wp (row above, same sublane)
            d = pltpu.roll(h, RW - Wp, 1)   # flat index + Wp (row below, same sublane)
        else:
            a = h
            d = h
        a_up = pltpu.roll(a, 1, 0) if S > 1 else a
        d_dn = pltpu.roll(d, S - 1, 0) if S > 1 else d
        first_grp = lane < Wp
        last_grp = lane >= (R - 1) * Wp
        up_i = jnp.where(first_grp, a_up, a)               # row i-1 (interior)
        dn_i = jnp.where(last_grp, d_dn, d)                # row i+1 (interior)

        top = (imod == 0) & first_grp                      # image row 0
        bot = (imod == Hp - 1) & last_grp                  # image row H-1
        up = jnp.where(top, dn_i, up_i)                    # reflect -> row 1
        down = jnp.where(bot, up_i, dn_i)                  # reflect -> row H-2

        o_ref[...] = ((up + (h + h) + down) * inv16).astype(o_ref.dtype)

    return kernel


def blur(x):
    """Equivalent of Blur.forward(x): depthwise 3x3 [1,2,1]x[1,2,1]/16 filter
    with reflect border (kornia filter2d default). NCHW in / NCHW out."""
    B, C, H, W = x.shape
    if H < 2 or W < 2:
        raise ValueError("reflect padding requires H >= 2 and W >= 2")

    R, Wp = _pick_row_pack(H, W)           # rows packed per lane group, padded width
    Hp = H // R                            # packed rows per plane
    RW = R * Wp
    total_rows = B * C * Hp
    itemsize = jnp.dtype(x.dtype).itemsize
    num_tc = _num_tensorcores()

    # Pack R image rows along the lane axis (lane-dense, unmasked stores).
    if Wp == W:
        x2 = x.reshape(total_rows, RW)     # free row-major reshape
    else:
        x2 = jnp.pad(x.reshape(B * C * H, W), ((0, 0), (0, Wp - W)))
        x2 = x2.reshape(total_rows, RW)

    S, padded_rows = _plan_blocks(total_rows, Hp, RW, itemsize, num_tc)
    if padded_rows != total_rows:
        x2 = jnp.pad(x2, ((0, padded_rows - total_rows), (0, 0)))
    grid = (padded_rows // S,)

    # Per-step VMEM budget: 2x in + 2x out buffers (input dtype) plus ~10
    # full-block f32 temporaries (the lane/sublane rolls force materialization).
    est = 4 * S * RW * itemsize + 10 * S * RW * 4
    try:
        phys_vmem = pltpu.get_tpu_info().vmem_capacity_bytes
    except Exception:
        phys_vmem = 64 * 1024 * 1024       # v7x-safe fallback
    vmem_limit = int(min(max(32 * 1024 * 1024, est * 3 // 2), phys_vmem * 3 // 4))

    out = pl.pallas_call(
        _make_blur_kernel(Hp, W, Wp, R, S),
        out_shape=jax.ShapeDtypeStruct((padded_rows, RW), x.dtype),
        grid=grid,
        in_specs=[pl.BlockSpec((S, RW), lambda i: (i, 0))],
        out_specs=pl.BlockSpec((S, RW), lambda i: (i, 0)),
        compiler_params=pltpu.CompilerParams(
            dimension_semantics=("parallel",),
            vmem_limit_bytes=vmem_limit),
    )(x2)

    if padded_rows != total_rows:
        out = out[:total_rows]
    if Wp == W:
        return out.reshape(B, C, H, W)
    return out.reshape(B * C * H, Wp)[:, :W].reshape(B, C, H, W)


def _reference_blur(x):
    """Pure-JAX reference (depthwise 3x3 conv, reflect pad, normalized). f32 out."""
    B, C, H, W = x.shape
    f = jnp.array([1.0, 2.0, 1.0], jnp.float32)
    k = f[:, None] * f[None, :]
    k = k / jnp.sum(k)
    xf = x.reshape(B * C, H, W).astype(jnp.float32)
    xp = jnp.pad(xf, ((0, 0), (1, 1), (1, 1)), mode="reflect")
    acc = jnp.zeros((B * C, H, W), jnp.float32)
    for di in range(3):
        for dj in range(3):
            acc = acc + k[di, dj] * xp[:, di:di + H, dj:dj + W]
    return acc.reshape(B, C, H, W)


if __name__ == "__main__":
    key = jax.random.PRNGKey(0)

    # Main case (matches the module's expected NCHW usage).
    x = jax.random.normal(key, (2, 4, 16, 16), dtype=jnp.float32)
    y = blur(x)
    jax.block_until_ready(y)
    assert y.shape == x.shape and y.dtype == x.dtype
    assert jnp.allclose(y.astype(jnp.float32), _reference_blur(x),
                        atol=1e-5, rtol=1e-5)

    # Native-dtype path: bf16 in -> f32 accumulate in-kernel -> bf16 out.
    xb = x.astype(jnp.bfloat16)
    yb = blur(xb)
    jax.block_until_ready(yb)
    assert yb.dtype == jnp.bfloat16
    assert jnp.allclose(yb.astype(jnp.float32), _reference_blur(xb),
                        atol=3e-2, rtol=3e-2)

    # Different spatial size: R=4 packing, full-extent block.
    x2 = jax.random.normal(jax.random.PRNGKey(1), (1, 3, 8, 32), dtype=jnp.float32)
    y2 = blur(x2)
    jax.block_until_ready(y2)
    assert jnp.allclose(y2, _reference_blur(x2), atol=1e-5, rtol=1e-5)

    # Width not packable to a multiple of 128: exercises the lane-pad path.
    x3 = jax.random.normal(jax.random.PRNGKey(2), (2, 3, 16, 20), dtype=jnp.float32)
    y3 = blur(x3)
    jax.block_until_ready(y3)
    assert jnp.allclose(y3, _reference_blur(x3), atol=1e-5, rtol=1e-5)

    # Row count with no aligned divisor: exercises the plane-padding path
    # (dummy planes appended, multi-step grid, output sliced back).
    x4 = jax.random.normal(jax.random.PRNGKey(3), (1, 37, 32, 512), dtype=jnp.float32)
    y4 = blur(x4)
    jax.block_until_ready(y4)
    assert jnp.allclose(y4, _reference_blur(x4), atol=1e-5, rtol=1e-5)

    print("KERNEL_OK")
</pallas_src>

<mosaic_0001>
module attributes {stable_mosaic.version = 11 : i64} {
  func.func @kernel(%arg0: i32, %arg1: memref<16x128xf32, #tpu.memory_space<vmem>>, %arg2: memref<16x128xf32, #tpu.memory_space<vmem>>) attributes {dimension_semantics = [#tpu.dimension_semantics<parallel>], iteration_bounds = array<i64: 1>, scalar_prefetch = 0 : i64, scratch_operands = 0 : i64, tpu.core_type = #tpu.core_type<tc>, window_params = [{transform_indices = @transform_0, window_bounds = array<i64: 16, 128>}, {transform_indices = @transform_1, window_bounds = array<i64: 16, 128>}]} {
    %c0 = arith.constant 0 : index
    %c0_0 = arith.constant 0 : index
    %0 = vector.load %arg1[%c0, %c0_0] : memref<16x128xf32, #tpu.memory_space<vmem>>, vector<16x128xf32>
    %1 = tpu.iota {dimensions = array<i32: 1>} : vector<1x128xi32>
    %c16_i32 = arith.constant 16 : i32
    %c0_i32 = arith.constant 0 : i32
    %2 = arith.cmpi eq, %c16_i32, %c0_i32 : i32
    %c1_i32 = arith.constant 1 : i32
    %3 = arith.select %2, %c1_i32, %c16_i32 : i32
    %4 = vector.broadcast %3 : i32 to vector<1x128xi32>
    %5 = arith.remsi %1, %4 : vector<1x128xi32>
    %c0_i32_1 = arith.constant 0 : i32
    %6 = vector.broadcast %c0_i32_1 : i32 to vector<1x128xi32>
    %7 = arith.cmpi ne, %5, %6 : vector<1x128xi32>
    %c0_i32_2 = arith.constant 0 : i32
    %8 = vector.broadcast %c0_i32_2 : i32 to vector<1x128xi32>
    %9 = arith.cmpi slt, %5, %8 : vector<1x128xi32>
    %c0_i32_3 = arith.constant 0 : i32
    %10 = arith.cmpi slt, %3, %c0_i32_3 : i32
    %11 = vector.broadcast %10 : i1 to vector<1x128xi1>
    %12 = vector.broadcast %11 : vector<1x128xi1> to vector<1x128xi1>
    %13 = arith.xori %9, %12 : vector<1x128xi1>
    %14 = arith.andi %13, %7 : vector<1x128xi1>
    %15 = vector.broadcast %3 : i32 to vector<1x128xi32>
    %16 = arith.addi %5, %15 : vector<1x128xi32>
    %17 = arith.select %14, %16, %5 : vector<1x128xi1>, vector<1x128xi32>
    %18 = tpu.iota {dimensions = array<i32: 0>} : vector<16x1xi32>
    %c2_i32 = arith.constant 2 : i32
    %c0_i32_4 = arith.constant 0 : i32
    %19 = arith.cmpi eq, %c2_i32, %c0_i32_4 : i32
    %c1_i32_5 = arith.constant 1 : i32
    %20 = arith.select %19, %c1_i32_5, %c2_i32 : i32
    %21 = vector.broadcast %20 : i32 to vector<16x1xi32>
    %22 = arith.remsi %18, %21 : vector<16x1xi32>
    %c0_i32_6 = arith.constant 0 : i32
    %23 = vector.broadcast %c0_i32_6 : i32 to vector<16x1xi32>
    %24 = arith.cmpi ne, %22, %23 : vector<16x1xi32>
    %c0_i32_7 = arith.constant 0 : i32
    %25 = vector.broadcast %c0_i32_7 : i32 to vector<16x1xi32>
    %26 = arith.cmpi slt, %22, %25 : vector<16x1xi32>
    %c0_i32_8 = arith.constant 0 : i32
    %27 = arith.cmpi slt, %20, %c0_i32_8 : i32
    %28 = vector.broadcast %27 : i1 to vector<16x1xi1>
    %29 = vector.broadcast %28 : vector<16x1xi1> to vector<16x1xi1>
    %30 = arith.xori %26, %29 : vector<16x1xi1>
    %31 = arith.andi %30, %24 : vector<16x1xi1>
    %32 = vector.broadcast %20 : i32 to vector<16x1xi32>
    %33 = arith.addi %22, %32 : vector<16x1xi32>
    %34 = arith.select %31, %33, %22 : vector<16x1xi1>, vector<16x1xi32>
    %c1_i32_9 = arith.constant 1 : i32
    %35 = tpu.dynamic_rotate %0 by %c1_i32_9 dim 1 : vector<16x128xf32>, i32 -> vector<16x128xf32>
    %c127_i32 = arith.constant 127 : i32
    %36 = tpu.dynamic_rotate %0 by %c127_i32 dim 1 : vector<16x128xf32>, i32 -> vector<16x128xf32>
    %c0_i32_10 = arith.constant 0 : i32
    %37 = vector.broadcast %c0_i32_10 : i32 to vector<1x128xi32>
    %38 = arith.cmpi eq, %17, %37 : vector<1x128xi32>
    %39 = vector.shape_cast %38 : vector<1x128xi1> to vector<1x128xi1>
    %40 = vector.broadcast %39 : vector<1x128xi1> to vector<16x128xi1>
    %41 = arith.select %40, %36, %35 : vector<16x128xi1>, vector<16x128xf32>
    %c15_i32 = arith.constant 15 : i32
    %42 = vector.broadcast %c15_i32 : i32 to vector<1x128xi32>
    %43 = arith.cmpi eq, %17, %42 : vector<1x128xi32>
    %44 = vector.shape_cast %43 : vector<1x128xi1> to vector<1x128xi1>
    %45 = vector.broadcast %44 : vector<1x128xi1> to vector<16x128xi1>
    %46 = arith.select %45, %35, %36 : vector<16x128xi1>, vector<16x128xf32>
    %47 = arith.addf %0, %0 : vector<16x128xf32>
    %48 = arith.addf %41, %47 : vector<16x128xf32>
    %49 = arith.addf %48, %46 : vector<16x128xf32>
    %c16_i32_11 = arith.constant 16 : i32
    %50 = tpu.dynamic_rotate %49 by %c16_i32_11 dim 1 : vector<16x128xf32>, i32 -> vector<16x128xf32>
    %c112_i32 = arith.constant 112 : i32
    %51 = tpu.dynamic_rotate %49 by %c112_i32 dim 1 : vector<16x128xf32>, i32 -> vector<16x128xf32>
    %c1_i32_12 = arith.constant 1 : i32
    %52 = tpu.dynamic_rotate %50 by %c1_i32_12 dim 0 : vector<16x128xf32>, i32 -> vector<16x128xf32>
    %c15_i32_13 = arith.constant 15 : i32
    %53 = tpu.dynamic_rotate %51 by %c15_i32_13 dim 0 : vector<16x128xf32>, i32 -> vector<16x128xf32>
    %c16_i32_14 = arith.constant 16 : i32
    %54 = vector.broadcast %c16_i32_14 : i32 to vector<1x128xi32>
    %55 = arith.cmpi slt, %1, %54 : vector<1x128xi32>
    %c112_i32_15 = arith.constant 112 : i32
    %56 = vector.broadcast %c112_i32_15 : i32 to vector<1x128xi32>
    %57 = arith.cmpi sge, %1, %56 : vector<1x128xi32>
    %58 = vector.shape_cast %55 : vector<1x128xi1> to vector<1x128xi1>
    %59 = vector.broadcast %58 : vector<1x128xi1> to vector<16x128xi1>
    %60 = arith.select %59, %52, %50 : vector<16x128xi1>, vector<16x128xf32>
    %61 = vector.shape_cast %57 : vector<1x128xi1> to vector<1x128xi1>
    %62 = vector.broadcast %61 : vector<1x128xi1> to vector<16x128xi1>
    %63 = arith.select %62, %53, %51 : vector<16x128xi1>, vector<16x128xf32>
    %c0_i32_16 = arith.constant 0 : i32
    %64 = vector.broadcast %c0_i32_16 : i32 to vector<16x1xi32>
    %65 = arith.cmpi eq, %34, %64 : vector<16x1xi32>
    %66 = vector.broadcast %65 : vector<16x1xi1> to vector<16x128xi1>
    %67 = vector.broadcast %55 : vector<1x128xi1> to vector<16x128xi1>
    %68 = arith.andi %66, %67 : vector<16x128xi1>
    %c1_i32_17 = arith.constant 1 : i32
    %69 = vector.broadcast %c1_i32_17 : i32 to vector<16x1xi32>
    %70 = arith.cmpi eq, %34, %69 : vector<16x1xi32>
    %71 = vector.broadcast %70 : vector<16x1xi1> to vector<16x128xi1>
    %72 = vector.broadcast %57 : vector<1x128xi1> to vector<16x128xi1>
    %73 = arith.andi %71, %72 : vector<16x128xi1>
    %74 = arith.select %68, %63, %60 : vector<16x128xi1>, vector<16x128xf32>
    %75 = arith.select %73, %60, %63 : vector<16x128xi1>, vector<16x128xf32>
    %76 = arith.addf %49, %49 : vector<16x128xf32>
    %77 = arith.addf %74, %76 : vector<16x128xf32>
    %78 = arith.addf %77, %75 : vector<16x128xf32>
    %cst = arith.constant 6.250000e-02 : f32
    %79 = vector.broadcast %cst : f32 to vector<16x128xf32>
    %80 = arith.mulf %78, %79 : vector<16x128xf32>
    %c0_18 = arith.constant 0 : index
    %c0_19 = arith.constant 0 : index
    %81 = vector.load %arg2[%c0_18, %c0_19] : memref<16x128xf32, #tpu.memory_space<vmem>>, vector<16x128xf32>
    tpu.vector_store %arg2[%c0_18, %c0_19], %80 {strides = array<i32>} : memref<16x128xf32, #tpu.memory_space<vmem>>, vector<16x128xf32>,
    return
  }
  func.func @transform_0(%arg0: i32) -> (i32, i32) {
    %c0_i32 = arith.constant 0 : i32
    %c0_i32_0 = arith.constant 0 : i32
    return %arg0, %c0_i32 : i32, i32
  }
  func.func @transform_1(%arg0: i32) -> (i32, i32) {
    %c0_i32 = arith.constant 0 : i32
    %c0_i32_0 = arith.constant 0 : i32
    return %arg0, %c0_i32 : i32, i32
  }
}

</mosaic_0001>

<bundles_post_ra>
// kernel: tpu_custom_call.1
= control target key start
LH: loop header
LB: loop body
LE: loop exit
PB: predicated region body
PF: predicated region fallthrough
CT: control target
= control target key end

     0   :  { %6 = vsyncpa [#allocation3], 0  ;;  %s301_s0 = inlined_call_operand.hbm [shape: f32[16,128], index: 0, kind: input, shape index: {}]   ;;  %s302_s1 = inlined_call_operand.hbm [shape: f32[16,128], index: 1, kind: output, shape index: {}]  }
   0x1   :  { %7 = vsyncpa [#allocation4], 0  ;;  %s12_s8 = sshll.u32 %s301_s0, 4  ;;  %s229_s9 = smov [#allocation2]   ;;  %s13_s8 = int_to_ptr.hbm [resolvable:$true] %s12_s8 }
   0x2   :  { %s14_s10 = sshll.u32 %s229_s9, 4  ;;  %s230_s11 = smov 128   ;;  %s15_s10 = int_to_ptr.vmem [resolvable:$true] %s14_s10 }
   0x3   :  { %s231_s12 = smov 8  }
   0x4   :  { %20 = dma.hbm_to_vmem [thread:$0]  %s13_s8, 256, %s15_s10, [#allocation3], %s230_s11, %s230_s11, %s231_s12  }
   0x5   :  { %225 = dma.done.wait [#allocation3], 256  }
   0x6   :  { %226 = vsyncadd [#allocation3], 4294967040  ;;  %v25_v0 = vld [vmem:[#allocation2] sm:$0xff]  ;;  %s232_s13 = smov 127   ;;  %s233_s14 = smov 1   ;;  %v26_v1 = vld [vmem:[#allocation2 + $0x8] sm:$0xff]  ;;  %v27_v2 = vlaneseq }
   0x7   :  { %72 = vrot.lane.b32.xlu1 %v25_v0, %s232_s13  ;;  %68 = vrot.lane.b32.xlu0 %v25_v0, %s233_s14  ;;  %v86_v5 = vadd.f32 %v25_v0, %v25_v0  ;;  %v87_v14 = vadd.f32 %v26_v1, %v26_v1  ;;  %s234_s0 = smov 112   ;;  %s235_s15 = smov 16  }
   0x8   :  { %v28_v3 = vand.u32 127, %v27_v2  ;;  %v42_v22 = vshrl.u32 %v27_v2, 7  ;;  %s236_s16 = smov [#allocation5]   ;;  %s156_s20 = sshll.u32 %s302_s1, 4  ;;  %s157_s20 = int_to_ptr.hbm [resolvable:$true] %s156_s20 }
   0x9   :  { %s154_s17 = sshll.u32 %s236_s16, 4  ;;  %s155_s17 = int_to_ptr.vmem [resolvable:$true] %s154_s17 }
   0xa   :  { %v33_v4 = vand.u32 15, %v28_v3  ;;  %v43_v23 = vadd.s32 8, %v42_v22  ;;  %v48_v24 = vand.u32 1, %v42_v22  ;;  %vm102_vm2 = vcmp.lt.s32.totalorder %v42_v22, 1 }
   0xb   :  { %vm110_vm4 = vcmp.lt.s32.totalorder %v28_v3, 16  ;;  %vm107_vm6 = vcmp.lt.s32.totalorder %v42_v22, 7  ;;  %vm111_vm7 = vcmp.ge.s32.totalorder %v28_v3, 112 }
   0xc   :  { %vm253_vm0 = vcmp.eq.s32.totalorder %v33_v4, 0  ;;  %vm257_vm1 = vcmp.eq.s32.totalorder %v33_v4, 15  ;;  %v55_v26 = vand.u32 1, %v43_v23  ;;  %vm120_vm3 = vcmp.eq.s32.totalorder %v48_v24, 0 }
   0xd   :  { %vm128_vm8 = vcmp.eq.s32.totalorder %v48_v24, 1  ;;  %vm274_vm10 = vmand %vm120_vm3, %vm110_vm4 }
   0xe   :  { %vm121_vm5 = vcmp.eq.s32.totalorder %v55_v26, 0  ;;  %vm269_vm9 = vcmp.eq.s32.totalorder %v55_v26, 1  ;;  %vm280_vm12 = vmand %vm128_vm8, %vm111_vm7 }
   0xf   :  { %74 = vrot.lane.b32.xlu1 %v26_v1, %s232_s13  ;;  %70 = vrot.lane.b32.xlu0 %v26_v1, %s233_s14  ;;  %vm127_vm11 = vmand %vm121_vm5, %vm110_vm4 }
  0x10   :  { %vm135_vm13 = vmand %vm269_vm9, %vm111_vm7 }
  0x79   :  { %v73_v7 = vpop.permute.xlu1 %72  ;;  %v69_v9 = vpop.permute.xlu0 %68 }
  0x7a   :  { %v79_v10 = vsel %vm253_vm0, %v73_v7, %v69_v9  ;;  %v84_v12 = vsel %vm257_vm1, %v69_v9, %v73_v7 }
  0x7b   :  { %v88_v11 = vadd.f32 %v86_v5, %v79_v10 }
  0x7d   :  { %v90_v13 = vadd.f32 %v88_v11, %v84_v12 }
  0x7f   :  { %96 = vrot.lane.b32.xlu0 %v90_v13, %s234_s0  ;;  %92 = vrot.lane.b32.xlu2 %v90_v13, %s235_s15  ;;  %v140_v37 = vadd.f32 %v90_v13, %v90_v13 }
  0x81   :  { %v75_v15 = vpop.permute.xlu1 %74  ;;  %v71_v16 = vpop.permute.xlu0 %70 }
  0x82   :  { %v80_v17 = vsel %vm253_vm0, %v75_v15, %v71_v16  ;;  %v85_v19 = vsel %vm257_vm1, %v71_v16, %v75_v15 }
  0x83   :  { %v89_v18 = vadd.f32 %v87_v14, %v80_v17 }
  0x85   :  { %v91_v20 = vadd.f32 %v89_v18, %v85_v19 }
  0x87   :  { %98 = vrot.lane.b32.xlu1 %v91_v20, %s234_s0  ;;  %94 = vrot.lane.b32.xlu2 %v91_v20, %s235_s15  ;;  %v141_v41 = vadd.f32 %v91_v20, %v91_v20 }
  0xd9   :  { %v93_v21 = vpop.permute.xlu2 %92 }
  0xda   :  { %v100_v29 = vrot.slane %v93_v21, 7 }
  0xe1   :  { %v95_v25 = vpop.permute.xlu2 %94 }
  0xe2   :  { %v101_v27 = vrot.slane %v95_v25, 7 }
  0xe4   :  { %v103_v33 = vsel %vm102_vm2, %v100_v29, %v101_v27  ;;  %v104_v34 = vsel %vm102_vm2, %v101_v27, %v100_v29 }
  0xe5   :  { %v114_v42 = vsel %vm110_vm4, %v104_v34, %v93_v21  ;;  %v115_v43 = vsel %vm110_vm4, %v103_v33, %v95_v25 }
  0xf1   :  { %v97_v28 = vpop.permute.xlu0 %96 }
  0xf2   :  { %v105_v35 = vrot.slane %v97_v28, 1 }
  0xf9   :  { %v99_v31 = vpop.permute.xlu1 %98 }
  0xfa   :  { %v106_v36 = vrot.slane %v99_v31, 1 }
  0xfc   :  { %v108_v39 = vsel %vm107_vm6, %v105_v35, %v106_v36  ;;  %v109_v40 = vsel %vm107_vm6, %v106_v36, %v105_v35 }
  0xfd   :  { %v118_v44 = vsel %vm111_vm7, %v108_v39, %v97_v28  ;;  %v119_v45 = vsel %vm111_vm7, %v109_v40, %v99_v31 }
  0xfe   :  { %v136_v46 = vsel %vm274_vm10, %v118_v44, %v114_v42  ;;  %v137_v47 = vsel %vm127_vm11, %v119_v45, %v115_v43  ;;  %v139_v50 = vsel %vm135_vm13, %v115_v43, %v119_v45  ;;  %v138_v51 = vsel %vm280_vm12, %v114_v42, %v118_v44 }
  0xff   :  { %v143_v48 = vadd.f32 %v141_v41, %v137_v47  ;;  %v142_v49 = vadd.f32 %v140_v37, %v136_v46 }
 0x101   :  { %v145_v52 = vadd.f32 %v143_v48, %v139_v50  ;;  %v144_v53 = vadd.f32 %v142_v49, %v138_v51 }
 0x103   :  { %v147_v54 = vmul.f32 0.0625, %v145_v52  ;;  %v146_v55 = vmul.f32 0.0625, %v144_v53 }
 0x105   :  { %149 = vst [vmem:[#allocation5 + $0x8] sm:$0xff] %v147_v54 }
 0x106   :  { %148 = vst [vmem:[#allocation5] sm:$0xff] %v146_v55 }
 0x107   :  { %162 = dma.vmem_to_hbm [thread:$0]  %s155_s17, 256, %s157_s20, [#allocation4], %s230_s11, %s230_s11, %s231_s12  }
 0x108   :  { %227 = dma.done.wait [#allocation4], 256  }
 0x109   :  { %228 = vsyncadd [#allocation4], 4294967040 }
 0x10a   :  { %167 = vsyncpa [#allocation3], 1 }
 0x10b   :  { %168 = vsyncpa [#allocation4], 1 }

</bundles_post_ra>
